<compile_context>
chip_gen: v7x
topology: tpu7x:2x2x1
jax: 0.10.0
libtpu: 0.0.40
codegen_flags: <defaults>
</compile_context>

<pallas_src>
import functools

import jax
import jax.numpy as jnp
from jax.experimental import pallas as pl
from jax.experimental.pallas import tpu as pltpu


def _tdnn_kernel(x_ref, wstk_ref, wregp_ref, bias_ref, out_ref, *, Bt, S, K):
    """Fused Conv1d -> ReLU -> Linear for one block of Bt batch elements.

    x_ref    : (1, Bt*S, C_in)   flat time-major rows of this batch block
    wstk_ref : (K*C_in, C_out)   stacked conv taps; row k*C_in+c == w_conv[o, c, k]
    wregp_ref: (n_out, S)        torch Linear weight, zero-padded from L_out to S
    bias_ref : (1+n_out, C_out)  row 0 = conv bias; rows 1.. = reg bias bcast on C_out
    out_ref  : (1, Bt*n_out, C_out)
    """
    _, C_out = wstk_ref.shape
    n_out = wregp_ref.shape[0]
    R = Bt * S

    # ---- in-kernel im2col: K row-shifted copies of x stacked along lanes -----
    # pltpu.roll runs on the XLU; rows that wrap around land in each batch
    # element's tail "junk" region, which the zero-padded regressor weights
    # multiply by exact zeros, so they never influence the output.
    x = x_ref[0]                                               # (R, C_in)
    taps = [x] + [pltpu.roll(x, shift=R - k, axis=0) for k in range(1, K)]
    x_stack = jnp.concatenate(taps, axis=-1)                   # (R, K*C_in)

    # ---- Conv1d as ONE MXU matmul of depth K*C_in; bias folded; ReLU on VPU --
    b_conv = bias_ref[0:1, :]                                  # (1, C_out)
    acc = jnp.dot(x_stack, wstk_ref[...],
                  preferred_element_type=jnp.float32)          # (R, C_out) f32
    act = jnp.maximum(acc + b_conv, 0.0)                       # f32 activations

    # ---- Regressor: one batched contraction over the (padded) time axis ------
    act_b = act.reshape(Bt, S, C_out)                          # leading-dim split only
    wreg_b = jnp.broadcast_to(wregp_ref[...][None], (Bt, n_out, S))
    res = jnp.einsum('bns,bsc->bnc', wreg_b, act_b,
                     preferred_element_type=jnp.float32)       # (Bt, n_out, C_out)
    res = res + bias_ref[1:, :][None]                          # regressor bias

    # Single full-tile store for the whole batch block.
    out_ref[0] = res.reshape(Bt * n_out, C_out).astype(out_ref.dtype)


def bc_forecasting_proxy_tdnn(x, w_conv, b_conv, w_reg, b_reg, kernelsize,
                              *, batch_block=None, param_dtype=jnp.float32):
    """TDNN branch of BC_Forecasting_Proxy.

    x: (B, S, C_in); w_conv: (C_out, C_in, K); b_conv: (C_out,);
    w_reg: (n_out, L_out); b_reg: (n_out,).  Returns (B, C_out, n_out).
    """
    B, S, C_in = x.shape
    C_out, C_in_w, K = w_conv.shape
    assert C_in_w == C_in and K == kernelsize
    L_out = S - K + 1
    n_out, L_out_w = w_reg.shape
    assert L_out_w == L_out

    # Batch-block choice: at least 2 grid steps when B >= 2 (pipelining + v7x
    # 2-TC sharding), with the per-step working set (double-buffered x block +
    # in-kernel stacked copy + activations) well under every generation's
    # default scoped-VMEM budget (16 MiB on v5e, 32 MiB on v6e/v7x).
    if batch_block is None:
        budget = 8 << 20
        Bt = 1
        for d in range(1, B + 1):
            if B % d:
                continue
            work = d * S * (C_in * (2 + K) + C_out) * 4
            if (B // d >= 2 or B == 1) and work <= budget:
                Bt = d
    else:
        Bt = batch_block
    assert B % Bt == 0, "batch_block must divide batch size"
    G = B // Bt

    # ---- one-time wrapper glue (no K-times x duplication in HBM) -------------
    x_grp = x.reshape(G, Bt * S, C_in).astype(param_dtype)
    w_stack = (jnp.transpose(w_conv, (2, 1, 0))                # (K, C_in, C_out)
               .reshape(K * C_in, C_out).astype(param_dtype))
    w_reg_pad = jnp.zeros((n_out, S), param_dtype).at[:, :L_out].set(
        w_reg.astype(param_dtype))
    bias_pack = jnp.concatenate(
        [b_conv.reshape(1, C_out).astype(jnp.float32),
         jnp.broadcast_to(b_reg.astype(jnp.float32)[:, None], (n_out, C_out))],
        axis=0)                                                # (1+n_out, C_out)

    itemsize = jnp.dtype(param_dtype).itemsize
    cost = pl.CostEstimate(
        flops=2 * B * L_out * C_out * K * C_in + 2 * B * C_out * n_out * S,
        transcendentals=0,
        bytes_accessed=((x_grp.size + w_stack.size + w_reg_pad.size) * itemsize
                        + bias_pack.size * 4 + B * n_out * C_out * 4))

    kernel = functools.partial(_tdnn_kernel, Bt=Bt, S=S, K=K)

    out = pl.pallas_call(
        kernel,
        out_shape=jax.ShapeDtypeStruct((G, Bt * n_out, C_out), jnp.float32),
        grid=(G,),
        in_specs=[
            pl.BlockSpec((1, Bt * S, C_in), lambda i: (i, 0, 0)),
            pl.BlockSpec((K * C_in, C_out), lambda i: (0, 0)),
            pl.BlockSpec((n_out, S), lambda i: (0, 0)),
            pl.BlockSpec((1 + n_out, C_out), lambda i: (0, 0)),
        ],
        out_specs=pl.BlockSpec((1, Bt * n_out, C_out), lambda i: (i, 0, 0)),
        compiler_params=pltpu.CompilerParams(
            dimension_semantics=("parallel",)),                # batch-block axis
        cost_estimate=cost,
    )(x_grp, w_stack, w_reg_pad, bias_pack)

    # (G, Bt*n_out, C_out) -> (B, n_out, C_out) -> (B, C_out, n_out); tiny, HBM-side.
    return jnp.transpose(out.reshape(B, n_out, C_out), (0, 2, 1))


def _reference(x, w_conv, b_conv, w_reg, b_reg, kernelsize):
    """Pure-JAX reference matching torch Conv1d + ReLU + Linear semantics."""
    B, S, C_in = x.shape
    C_out = w_conv.shape[0]
    K = kernelsize
    L_out = S - K + 1
    x_t = jnp.transpose(x, (0, 2, 1))                          # (B, C_in, S)
    conv = jnp.zeros((B, C_out, L_out), jnp.float32)
    for k in range(K):
        conv = conv + jnp.einsum('bcl,oc->bol', x_t[:, :, k:k + L_out],
                                 w_conv[:, :, k])
    conv = conv + b_conv[None, :, None]
    act = jnp.maximum(conv, 0.0)
    return jnp.einsum('bol,nl->bon', act, w_reg) + b_reg[None, None, :]


if __name__ == "__main__":
    # args-equivalent hyperparameters (TDNN branch)
    batch = 2
    npredictors = 4     # args.npredictors (conv in_channels)
    seqlength = 16      # args.seqlength
    kernelsize = 3      # args.kernelsize
    noutput = 8         # args.noutput (conv out_channels == regressor out_features)
    L_out = seqlength - kernelsize + 1

    key = jax.random.PRNGKey(0)
    kx, k1, k2, k3, k4 = jax.random.split(key, 5)

    # deterministic synthetic parameters (shapes match nn.Conv1d / nn.Linear)
    x = jax.random.normal(kx, (batch, seqlength, npredictors), jnp.float32)
    w_conv = 0.1 * jax.random.normal(k1, (noutput, npredictors, kernelsize), jnp.float32)
    b_conv = 0.1 * jax.random.normal(k2, (noutput,), jnp.float32)
    w_reg = 0.1 * jax.random.normal(k3, (noutput, L_out), jnp.float32)
    b_reg = 0.1 * jax.random.normal(k4, (noutput,), jnp.float32)

    out = bc_forecasting_proxy_tdnn(x, w_conv, b_conv, w_reg, b_reg, kernelsize)
    out = jax.block_until_ready(out)

    ref = _reference(x, w_conv, b_conv, w_reg, b_reg, kernelsize)
    assert out.shape == (batch, noutput, noutput), out.shape
    assert jnp.allclose(out, ref, atol=1e-4, rtol=1e-4), "mismatch vs reference"

    # TODO(synk): RNN/LSTM/GRU branches of BC_Forecasting_Proxy are sequential
    # recurrences; only the TDNN branch is implemented as a Pallas kernel here.
    print("KERNEL_OK")
</pallas_src>

<mosaic_0001>
module attributes {stable_mosaic.version = 11 : i64} {
  func.func @_tdnn_kernel(%arg0: i32, %arg1: memref<1x16x4xf32, #tpu.memory_space<vmem>>, %arg2: memref<12x8xf32, #tpu.memory_space<vmem>>, %arg3: memref<8x16xf32, #tpu.memory_space<vmem>>, %arg4: memref<9x8xf32, #tpu.memory_space<vmem>>, %arg5: memref<1x8x8xf32, #tpu.memory_space<vmem>>) attributes {dimension_semantics = [#tpu.dimension_semantics<parallel>], iteration_bounds = array<i64: 2>, scalar_prefetch = 0 : i64, scratch_operands = 0 : i64, tpu.core_type = #tpu.core_type<tc>, window_params = [{transform_indices = @transform_0, window_bounds = array<i64: 1, 16, 4>}, {pipeline_mode = #tpu.pipeline_mode<synchronous>, transform_indices = @transform_1, window_bounds = array<i64: 12, 8>}, {pipeline_mode = #tpu.pipeline_mode<synchronous>, transform_indices = @transform_2, window_bounds = array<i64: 8, 16>}, {pipeline_mode = #tpu.pipeline_mode<synchronous>, transform_indices = @transform_3, window_bounds = array<i64: 9, 8>}, {transform_indices = @transform_4, window_bounds = array<i64: 1, 8, 8>}]} {
    %c0 = arith.constant 0 : index
    %c0_0 = arith.constant 0 : index
    %c0_1 = arith.constant 0 : index
    %0 = vector.load %arg1[%c0, %c0_0, %c0_1] : memref<1x16x4xf32, #tpu.memory_space<vmem>>, vector<1x16x4xf32>
    %1 = vector.shape_cast %0 : vector<1x16x4xf32> to vector<16x4xf32>
    %c15_i32 = arith.constant 15 : i32
    %2 = tpu.dynamic_rotate %1 by %c15_i32 dim 0 : vector<16x4xf32>, i32 -> vector<16x4xf32>
    %c14_i32 = arith.constant 14 : i32
    %3 = tpu.dynamic_rotate %1 by %c14_i32 dim 0 : vector<16x4xf32>, i32 -> vector<16x4xf32>
    %4 = tpu.concatenate %1, %2, %3 in 1 : vector<16x4xf32>, vector<16x4xf32>, vector<16x4xf32> -> vector<16x12xf32>
    %c0_2 = arith.constant 0 : index
    %c0_3 = arith.constant 0 : index
    %5 = vector.load %arg4[%c0_2, %c0_3] : memref<9x8xf32, #tpu.memory_space<vmem>>, vector<1x8xf32>
    %c0_4 = arith.constant 0 : index
    %c0_5 = arith.constant 0 : index
    %6 = vector.load %arg2[%c0_4, %c0_5] : memref<12x8xf32, #tpu.memory_space<vmem>>, vector<12x8xf32>
    %cst = arith.constant dense<0.000000e+00> : vector<16x8xf32>
    %7 = tpu.matmul %4, %6, %cst {dimension_numbers = #tpu.dot_dimension_numbers<[1], [0], [0], [1], [0, 0, 1, 1], [], []>} : vector<16x12xf32>, vector<12x8xf32>, vector<16x8xf32> -> vector<16x8xf32>
    %8 = vector.broadcast %5 : vector<1x8xf32> to vector<16x8xf32>
    %9 = arith.addf %7, %8 : vector<16x8xf32>
    %cst_6 = arith.constant 0.000000e+00 : f32
    %10 = vector.broadcast %cst_6 : f32 to vector<16x8xf32>
    %11 = arith.maximumf %9, %10 : vector<16x8xf32>
    %12 = vector.shape_cast %11 : vector<16x8xf32> to vector<1x16x8xf32>
    %c0_7 = arith.constant 0 : index
    %c0_8 = arith.constant 0 : index
    %13 = vector.load %arg3[%c0_7, %c0_8] : memref<8x16xf32, #tpu.memory_space<vmem>>, vector<8x16xf32>
    %14 = vector.shape_cast %13 : vector<8x16xf32> to vector<1x8x16xf32>
    "tpu.trace_start"() <{level = 10 : i32, message = "bns,bsc->bnc"}> : () -> ()
    %cst_9 = arith.constant dense<0.000000e+00> : vector<1x8x8xf32>
    %15 = tpu.matmul %14, %12, %cst_9 {dimension_numbers = #tpu.dot_dimension_numbers<[2], [1], [1], [2], [0, 0, 0, 1, 1, 2], [0], [0]>} : vector<1x8x16xf32>, vector<1x16x8xf32>, vector<1x8x8xf32> -> vector<1x8x8xf32>
    "tpu.trace_stop"() : () -> ()
    %c1 = arith.constant 1 : index
    %c0_10 = arith.constant 0 : index
    %16 = vector.load %arg4[%c1, %c0_10] : memref<9x8xf32, #tpu.memory_space<vmem>>, vector<8x8xf32>
    %17 = vector.shape_cast %16 : vector<8x8xf32> to vector<1x8x8xf32>
    %18 = arith.addf %15, %17 : vector<1x8x8xf32>
    %19 = vector.shape_cast %18 : vector<1x8x8xf32> to vector<8x8xf32>
    %c0_11 = arith.constant 0 : index
    %c0_12 = arith.constant 0 : index
    %c0_13 = arith.constant 0 : index
    %20 = vector.load %arg5[%c0_11, %c0_12, %c0_13] : memref<1x8x8xf32, #tpu.memory_space<vmem>>, vector<1x8x8xf32>
    %21 = vector.shape_cast %20 : vector<1x8x8xf32> to vector<8x8xf32>
    %22 = vector.shape_cast %19 : vector<8x8xf32> to vector<1x8x8xf32>
    tpu.vector_store %arg5[%c0_11, %c0_12, %c0_13], %22 {strides = array<i32>} : memref<1x8x8xf32, #tpu.memory_space<vmem>>, vector<1x8x8xf32>,
    return
  }
  func.func @transform_0(%arg0: i32) -> (i32, i32, i32) {
    %c0_i32 = arith.constant 0 : i32
    %c0_i32_0 = arith.constant 0 : i32
    %c0_i32_1 = arith.constant 0 : i32
    return %arg0, %c0_i32, %c0_i32_0 : i32, i32, i32
  }
  func.func @transform_1(%arg0: i32) -> (i32, i32) {
    %c0_i32 = arith.constant 0 : i32
    %c0_i32_0 = arith.constant 0 : i32
    %c0_i32_1 = arith.constant 0 : i32
    return %c0_i32, %c0_i32_0 : i32, i32
  }
  func.func @transform_2(%arg0: i32) -> (i32, i32) {
    %c0_i32 = arith.constant 0 : i32
    %c0_i32_0 = arith.constant 0 : i32
    %c0_i32_1 = arith.constant 0 : i32
    return %c0_i32, %c0_i32_0 : i32, i32
  }
  func.func @transform_3(%arg0: i32) -> (i32, i32) {
    %c0_i32 = arith.constant 0 : i32
    %c0_i32_0 = arith.constant 0 : i32
    %c0_i32_1 = arith.constant 0 : i32
    return %c0_i32, %c0_i32_0 : i32, i32
  }
  func.func @transform_4(%arg0: i32) -> (i32, i32, i32) {
    %c0_i32 = arith.constant 0 : i32
    %c0_i32_0 = arith.constant 0 : i32
    %c0_i32_1 = arith.constant 0 : i32
    return %arg0, %c0_i32, %c0_i32_0 : i32, i32, i32
  }
}

</mosaic_0001>

<bundles_post_ra>
// kernel: tpu_custom_call.1
= control target key start
LH: loop header
LB: loop body
LE: loop exit
PB: predicated region body
PF: predicated region fallthrough
CT: control target
= control target key end

     0   :  { %9 = vsyncpa [#allocation3], 0  ;;  %s783_s0 = inlined_call_operand.vmem [shape: f32[2,16,4], index: 0, kind: input, shape index: {}]   ;;  %s784_s1 = inlined_call_operand.vmem [shape: f32[12,8], index: 1, kind: input, shape index: {}]   ;;  %s785_s2 = inlined_call_operand.vmem [shape: f32[8,16], index: 2, kind: input, shape index: {}]   ;;  %s786_s3 = inlined_call_operand.vmem [shape: f32[9,8], index: 3, kind: input, shape index: {}]   ;;  %s787_s4 = inlined_call_operand.hbm [shape: f32[2,8,8], index: 4, kind: output, shape index: {}]  }
   0x1   :  { %11 = vsyncpa [#allocation3 + $0x1], 0  ;;  %s665_s15 = smov 0   ;;  %s667_s16 = smov 0  }
   0x2   :  { %s669_s17 = smov 0   ;;  %s671_s18 = smov 0  }
   0x3 LB: > { %s686_s19 = sadd.s32 4294967295, %s631_s18   ;;  %s477_s20 = sadd.s32 4294967294, %s631_s18   ;;  %s631_s18 = sphi %s671_s18, %s793_s18   ;;  %s627_s17 = sphi %s669_s17, %s792_s17   ;;  %s623_s16 = sphi %s667_s16, %s791_s16   ;;  %s619_s15 = sphi %s665_s15, %s790_s15  }
   0x4   : > { %s690_s21 = sadd.s32 1, %s631_s18   ;;  %s113_s22 = sadd.s32 1, %s627_s17 }
   0x5   : > { %s110_s23 = ssub.s32 %s631_s18, %s690_s21  ;;  %p123_p0 = scmp.ne.s32.totalorder %s627_s17, %s623_s16 }
   0x6   : > { %p111_p1 = scmp.eq.s32.totalorder %s110_s23, 0  ;;  %p124_p2 = scmp.eq.s32.totalorder %s686_s19, 1 }
   0x7   : > { %p129_p3 = scmp.ne.s32.totalorder %s623_s16, %s619_s15  ;;  %p130_p4 = scmp.eq.s32.totalorder %s477_s20, 1 }
   0x8   : > { %s701_s24 = scalar_select %p111_p1, %s627_s17, %s113_s22  }
   0x9   : > { %p703_p5 = por %p124_p2, %p123_p0  ;;  %p707_p6 = por %p130_p4, %p129_p3 }
   0xa   : > { %p480_p7 = scmp.ge.s32.totalorder %s631_s18, 1  ;;  %p165_p8 = scmp.lt.s32.totalorder %s631_s18, 3 }
   0xc   : > { %p166_p9 = pnand %p480_p7, %p165_p8 }
   0xd   : > { %p191_p10 = scmp.lt.s32.totalorder (!%p166_p9), %s686_s19, 1  ;;  %v200_v0 = vlaneseq (!%p166_p9)  ;;  %v233_v1 = vld [vmem:[%s784_s1] sm:$0xff] (!%p166_p9)  ;;  %v234_v2 = vld [vmem:[%s784_s1 + $0x8] sm:$0xf] (!%p166_p9)  ;;  %vm246_vm0 = vcmask (!%p166_p9), 1043456   ;;  %vm633_vm1 = vmmov (!%p166_p9), 1  }
   0xe   : > { %169 = sbr.rel (%p166_p9) target bundleno = 600 (0x258), region = 36  ;;  %v515_v3 = vpack.c.bf16 (!%p166_p9), %v234_v2, %v233_v1  ;;  %vm516_vm2 = vmpackc.low (!%p166_p9), %vm246_vm0, %vm633_vm1  ;;  %s634_s10 = smov (!%p166_p9), 4   ;;  %vm226_vm5 = vcmask (!%p166_p9), 31744   ;;  %vm229_vm6 = vcmask (!%p166_p9), 64512   ;;  %vm239_vm7 = vcmask (!%p166_p9), 97280   ;;  %v327_v33 = vld [vmem:[%s785_s2] sm:$0xff] (!%p166_p9) }
   0xf   : > { %v201_v4 = vshrl.u32 (!%p166_p9), %v200_v0, 7  ;;  %s635_s11 = smov (!%p166_p9), 8   ;;  %v636_v23 = vmov (!%p166_p9), 0.0|0.0   ;;  %vm637_vm8 = vmmov (!%p166_p9), 0   ;;  %v638_v24 = vmov (!%p166_p9), 0.0   ;;  %s188_s22 = sand.u32 (!%p166_p9), 1, %s623_s16  }
  0x10   : > { %517 = vmatprep.subr.msk.bf16.mxu0 (!%p166_p9), %vm516_vm2, %v515_v3  ;;  %521 = vmatprep.subr.bf16.mxu1 (!%p166_p9), %v636_v23  ;;  %v484_v25 = vld [vmem:[%s786_s3] ss:$0 sm:$0xff] (!%p166_p9)  ;;  %vm329_vm9 = vcmask (!%p166_p9), 130048   ;;  %s481_s23 = sshll.u32 (!%p166_p9), %s188_s22, 3  ;;  %v328_v34 = vld [vmem:[%s786_s3 + $0x1] sm:$0xff] (!%p166_p9)  ;;  %s490_s29 = sshll.u32 (!%p166_p9), %s686_s19, 7 }
  0x11   : > { %520 = vmatpush3.bf16.msk.msra.mxu0 (!%p166_p9), %vm516_vm2, %v515_v3  ;;  %vm202_vm3 = vcmp.lt.s32.totalorder (!%p166_p9), %v201_v4, 7  ;;  %vm207_vm4 = vcmp.lt.s32.totalorder (!%p166_p9), %v201_v4, 6  ;;  %512 = vmatprep.mubr.msk.f32.mxu1 (!%p166_p9), %vm637_vm8, %v638_v24  ;;  %s190_s30 = scalar_lea.vmem (!%p166_p9), [#allocation2], %s481_s23  ;;  %s740_s8 = scalar_lea.hbm (!%p166_p9), %s787_s4, %s490_s29 }
  0x15   : > { %s192_s5 = scalar_select %p191_p10, %s686_s19, 1 }
  0x16   : > { %s639_s19 = smov [#allocation2]  }
  0x17   : > { %s493_s6 = sshll.u32 %s192_s5, 4  ;;  %s418_s5 = sshll.u32 %s190_s30, 4  ;;  %s742_s5 = int_to_ptr.vmem [resolvable:$true] %s418_s5 }
  0x18   : > { %s195_s9 = scalar_lea.vmem %s783_s0, %s493_s6 }
  0x19   : > { %v196_v5 = vld [vmem:[%s195_s9] sm:$0xff]  ;;  %v197_v6 = vld [vmem:[%s195_s9 + $0x8] sm:$0xff]  ;;  %s405_s9 = scalar_lea.sflag [#allocation3], %s188_s22 }
  0x1a   : > { %v198_v7 = vrot.slane %v196_v5, 1  ;;  %v199_v8 = vrot.slane %v197_v6, 1  ;;  %v205_v9 = vrot.slane %v196_v5, 2  ;;  %v206_v10 = vrot.slane %v197_v6, 2 }
  0x1c   : > { %v203_v11 = vsel %vm202_vm3, %v198_v7, %v199_v8  ;;  %v208_v12 = vsel %vm207_vm4, %v205_v9, %v206_v10  ;;  %v204_v13 = vsel %vm202_vm3, %v199_v8, %v198_v7  ;;  %v209_v14 = vsel %vm207_vm4, %v206_v10, %v205_v9 }
  0x1d   : > { %212 = vrot.lane.b32.xlu0 %v203_v11, %s634_s10  ;;  %220 = vrot.lane.b32.xlu1 %v208_v12, %s635_s11 }
  0x21   : > { %214 = vrot.lane.b32.xlu0 %v204_v13, %s634_s10  ;;  %222 = vrot.lane.b32.xlu1 %v209_v14, %s635_s11  ;;  %s569_s10 = scalar_lea.vmem %s742_s5, 128  ;;  %s573_s11 = sshll.u32 %s639_s19, 4  ;;  %s574_s11 = int_to_ptr.vmem [resolvable:$false] %s573_s11 }
  0x22   : > { %p570_p11 = scmp.ne.s32.totalorder %s742_s5, %s569_s10  ;;  %s575_s12 = scalar_lea.vmem %s574_s11, 256 }
  0x23   : > { %p576_p0 = scmp.lt.s32.totalorder %s742_s5, %s574_s11  ;;  %p577_p1 = scmp.lt.s32.totalorder %s575_s12, %s569_s10 }
  0x24   : > { %p571_p12 = pnand %p570_p11, %p703_p5 }
  0x25   : > { %p578_p2 = por %p577_p1, %p576_p0 }
  0x26   : > { %p572_p13 = pneg %p571_p12 }
  0x28   : > { %p579_p3 = pnand %p578_p2, %p572_p13 }
  0x8f   : > { %v213_v15 = vpop.permute.xlu0 %212  ;;  %v221_v16 = vpop.permute.xlu1 %220 }
  0x90   : > { %v227_v17 = vsel %vm226_vm5, %v196_v5, %v213_v15 }
  0x91   : > { %v230_v18 = vsel %vm229_vm6, %v227_v17, %v221_v16 }
  0x92   : > { %505 = vmatprep.mubr.msk.f32.mxu0 %vm239_vm7, %v230_v18 }
  0x93   : > { %v215_v19 = vpop.permute.xlu0 %214  ;;  %v223_v20 = vpop.permute.xlu1 %222 }
  0x94   : > { %v228_v21 = vsel %vm226_vm5, %v197_v6, %v215_v19 }
  0x95   : > { %v231_v22 = vsel %vm229_vm6, %v228_v21, %v223_v20 }
  0x96   : > { %506 = vmatmul.mubr.msk.f32.vlgmr.msra.gmra.mrb[0].mxu0 %vm239_vm7, %v231_v22 }
 0x169   : > { %v507_v26 = vpop.f32.mrb[0].mxu0 }
 0x16a   : > { %v322_v27 = vadd.f32 %v507_v26, %v484_v25  ;;  %v316_v28 = vpop.f32.mrb[1].mxu0 }
 0x16b   : > { %v317_v29 = vadd.f32 %v484_v25, %v316_v28 }
 0x16c   : > { %v326_v30 = vmax.f32 %v322_v27, 0.0 }
 0x16d   : > { %v325_v31 = vmax.f32 %v317_v29, 0.0 }
 0x16f   : > { %v522_v32 = vpack.c.bf16 %v326_v30, %v325_v31 }
 0x171   : > { %523 = vmatpush3.bf16.msra.mxu1 %v522_v32 }
 0x174   : > { %513 = vmatmul.mubr.msk.f32.vlgmr.msra.gmra.mrb[0].mxu1 %vm329_vm9, %v327_v33 }
 0x247   : > { %v399_v35 = vpop.f32.mrb[0].mxu1 }
 0x248   : > { %v400_v36 = vadd.f32 %v399_v35, %v328_v34  ;;  %v514_v37 = vpop.f32.mrb[1].mxu1 }
 0x24a   : > { %403 = vst.msk [vmem:[%s190_s30] sm:$0xff] %vm229_vm6, %v400_v36 }
 0x24b   : > { %582 = shalt.err (!%p579_p3)
}
 0x24c   : > { %s583_s13 = scalar_lea.hbm %s740_s8, 128  ;;  %s587_s22 = scalar_lea.hbm %s787_s4, 256 }
 0x24d   : > { %p584_p4 = scmp.ne.s32.totalorder %s740_s8, %s583_s13  ;;  %p588_p9 = scmp.lt.u32.totalorder %s740_s8, %s787_s4 }
 0x24e   : > { %p589_p10 = scmp.lt.u32.totalorder %s587_s22, %s583_s13  ;;  %p591_p12 = scmp.lt.u32.totalorder %s583_s13, %s740_s8 }
 0x24f   : > { %p585_p7 = pnand %p584_p4, %p703_p5 }
 0x250   : > { %p590_p11 = por %p589_p10, %p588_p9 }
 0x251   : > { %p586_p8 = pneg %p585_p7 }
 0x252   : > { %p592_p13 = por %p591_p12, %p590_p11 }
 0x254   : > { %p593_p0 = pnand %p592_p13, %p586_p8 }
 0x256   : > { %596 = shalt.err (!%p593_p0)
}
 0x257   : > { %524 = dma.vmem_to_hbm [thread:$0]  (%p703_p5), %s742_s5, 128, %s740_s8, %s405_s9  }
 0x258 PF: > { %p530_p1 = scmp.ge.s32.totalorder %s631_s18, 2  ;;  %s430_s28 = sand.u32 1, %s619_s15  }
 0x259   : > { %s431_s29 = scalar_lea.sflag [#allocation3], %s430_s28 }
 0x25a   : > { %p527_p2 = pnand %p530_p1, %p707_p6 }
 0x25c   : > { %614 = dma.done.wait (!%p527_p2), %s431_s29, 128  }
 0x25d   : > { %616 = vsyncadd (!%p527_p2), %s431_s29, 4294967168  ;;  %p14_p3 = scmp.ge.s32.totalorder %s690_s21, 4   ;;  %s790_s15 = smov %s623_s16 }
 0x25e   : > { %s791_s16 = smov %s627_s17  ;;  %s792_s17 = smov %s701_s24 }
 0x25f   : > { %s793_s18 = smov %s690_s21  ;;  %16 = sbr.rel (!%p14_p3) target bundleno = 3 (0x3), region = 71 }
 0x266   :  { %436 = vsyncpa [#allocation3], 1 }
 0x267   :  { %438 = vsyncpa [#allocation3 + $0x1], 1 }

</bundles_post_ra>
